<compile_context>
chip_gen: v7x
topology: tpu7x:2x2x1
jax: 0.10.0
libtpu: 0.0.40
codegen_flags: <defaults>
</compile_context>

<pallas_src>
import functools

import jax
import jax.numpy as jnp
from jax.experimental import pallas as pl
from jax.experimental.pallas import tpu as pltpu


def _round_up(x, m):
    return ((x + m - 1) // m) * m


def critic_kernel(s_ref, a_ref, w1s_ref, w1a_ref, b1_ref, w2_ref, b2_ref,
                  w3_ref, b3_ref, o_ref):
    h_dim = w2_ref.shape[-1]

    # bf16 operands for the MXU, f32 accumulation everywhere.
    s = s_ref[...].astype(jnp.bfloat16)        # (TB, s_dim)
    a = a_ref[...].astype(jnp.bfloat16)        # (TB, a_dim)

    # Layer 1 for BOTH heads in one MXU pass: weights stacked along N = 2*H.
    # In-kernel "concat(s, a)" via the split weight halves.
    h1 = (jnp.dot(s, w1s_ref[...], preferred_element_type=jnp.float32)
          + jnp.dot(a, w1a_ref[...], preferred_element_type=jnp.float32)
          + b1_ref[...])                                      # (TB, 2H) f32
    h1 = jnp.maximum(h1, 0.0).astype(jnp.bfloat16)

    def head(h):
        # Lane-aligned slice when h_dim % 128 == 0 (the common case).
        h1_h = h1[:, h * h_dim:(h + 1) * h_dim]               # (TB, H) bf16
        # layer 2
        h2 = (jnp.dot(h1_h, w2_ref[h], preferred_element_type=jnp.float32)
              + b2_ref[h])
        h2 = jnp.maximum(h2, 0.0)                             # (TB, H) f32
        # layer 3: Linear(H, 1) as VPU multiply + XLU lane-reduce (no N=1 matmul)
        return jnp.sum(h2 * w3_ref[h], axis=-1, keepdims=True) + b3_ref[h]

    o_ref[:, 0:1] = head(0).astype(o_ref.dtype)
    o_ref[:, 1:2] = head(1).astype(o_ref.dtype)


@functools.partial(jax.jit, static_argnames=("block_b",))
def critic_forward(s, a, params, *, block_b=1024):
    """Fused forward of Critic: returns (q1, q2), each (B, 1) float32."""
    W1S, W1A, B1, W2, B2, W3, B3 = (params[k] for k in
                                    ("W1S", "W1A", "B1", "W2", "B2", "W3", "B3"))
    B, s_dim = s.shape
    a_dim = a.shape[1]
    h_dim = W2.shape[-1]

    # Batch tile: multiple of 8, up to block_b rows; pad B to a tile multiple.
    TB = min(block_b, _round_up(B, 8))
    B_pad = _round_up(B, TB)
    if B_pad != B:
        s = jnp.pad(s, ((0, B_pad - B), (0, 0)))
        a = jnp.pad(a, ((0, B_pad - B), (0, 0)))

    # MXU-side weights in bf16 (halves their HBM/VMEM footprint); biases and
    # the VPU-side w3 rows stay f32.
    w1s = W1S.astype(jnp.bfloat16)
    w1a = W1A.astype(jnp.bfloat16)
    w2 = W2.astype(jnp.bfloat16)

    # Weights: full-array blocks with constant index_map -> VMEM-resident.
    def resident(shape):
        return pl.BlockSpec(shape, lambda i: (0,) * len(shape))

    out = pl.pallas_call(
        critic_kernel,
        out_shape=jax.ShapeDtypeStruct((B_pad, 2), jnp.float32),
        grid=(B_pad // TB,),
        in_specs=[
            pl.BlockSpec((TB, s_dim), lambda i: (i, 0)),          # s tile
            pl.BlockSpec((TB, a_dim), lambda i: (i, 0)),          # a tile
            resident((s_dim, 2 * h_dim)),                         # W1S (heads stacked on N)
            resident((a_dim, 2 * h_dim)),                         # W1A
            resident((1, 2 * h_dim)),                             # b1
            resident((2, h_dim, h_dim)),                          # W2 (per head)
            resident((2, 1, h_dim)),                              # b2
            resident((2, 1, h_dim)),                              # w3 rows
            pl.BlockSpec(memory_space=pltpu.MemorySpace.SMEM),    # b3 scalars
        ],
        out_specs=pl.BlockSpec((TB, 2), lambda i: (i, 0)),
        compiler_params=pltpu.CompilerParams(
            dimension_semantics=("parallel",)),                   # v7x: 2 TCs
    )(s, a, w1s, w1a, B1, w2, B2, W3, B3)

    return out[:B, 0:1], out[:B, 1:2]


def init_critic_params(key, s_dim, a_dim, h_dim):
    """Deterministic synthetic init for both Q heads.

    Weights are stored transposed vs. torch.nn.Linear, i.e. (in, out).  The
    two heads' layer-1 weights are stacked along the output axis (columns
    [0:h] = head 0, [h:2h] = head 1) and pre-split into state/action halves so
    the kernel never needs cat(s, a).  Layers 2/3 are stacked on a leading
    head axis of size 2.
    """
    ks = jax.random.split(key, 6)
    in_dim = s_dim + a_dim
    sc1 = 1.0 / jnp.sqrt(in_dim)
    sc2 = 1.0 / jnp.sqrt(h_dim)
    w1 = jax.random.uniform(ks[0], (in_dim, 2 * h_dim), jnp.float32, -sc1, sc1)
    return dict(
        W1S=w1[:s_dim, :],
        W1A=w1[s_dim:, :],
        B1=jax.random.uniform(ks[1], (1, 2 * h_dim), jnp.float32, -sc1, sc1),
        W2=jax.random.uniform(ks[2], (2, h_dim, h_dim), jnp.float32, -sc2, sc2),
        B2=jax.random.uniform(ks[3], (2, 1, h_dim), jnp.float32, -sc2, sc2),
        W3=jax.random.uniform(ks[4], (2, 1, h_dim), jnp.float32, -sc2, sc2),
        B3=jax.random.uniform(ks[5], (2,), jnp.float32, -sc2, sc2),
    )


def critic_ref_bf16(s, a, params):
    """Pure-JAX reference with the same bf16-operand / f32-accumulate numerics."""
    h_dim = params["W2"].shape[-1]
    sb = s.astype(jnp.bfloat16)
    ab = a.astype(jnp.bfloat16)
    outs = []
    for h in range(2):
        c = slice(h * h_dim, (h + 1) * h_dim)
        h1 = (jnp.dot(sb, params["W1S"][:, c].astype(jnp.bfloat16),
                      preferred_element_type=jnp.float32)
              + jnp.dot(ab, params["W1A"][:, c].astype(jnp.bfloat16),
                        preferred_element_type=jnp.float32)
              + params["B1"][:, c])
        h1 = jnp.maximum(h1, 0.0).astype(jnp.bfloat16)
        h2 = jnp.dot(h1, params["W2"][h].astype(jnp.bfloat16),
                     preferred_element_type=jnp.float32) + params["B2"][h]
        h2 = jnp.maximum(h2, 0.0)
        outs.append(jnp.sum(h2 * params["W3"][h], axis=-1, keepdims=True)
                    + params["B3"][h])
    return tuple(outs)


def critic_ref_f32(s, a, params):
    """Pure-f32 reference matching the PyTorch module semantics."""
    h_dim = params["W2"].shape[-1]
    x = jnp.concatenate([s, a], axis=1)
    outs = []
    for h in range(2):
        c = slice(h * h_dim, (h + 1) * h_dim)
        w1 = jnp.concatenate([params["W1S"][:, c], params["W1A"][:, c]], axis=0)
        z = jnp.maximum(x @ w1 + params["B1"][:, c], 0.0)
        z = jnp.maximum(z @ params["W2"][h] + params["B2"][h], 0.0)
        outs.append(z @ params["W3"][h].T + params["B3"][h])
    return tuple(outs)


if __name__ == "__main__":
    key = jax.random.PRNGKey(0)
    k_s, k_a, k_p = jax.random.split(key, 3)

    # Small deterministic shapes; h_dim lane-aligned at 128.
    B, s_dim, a_dim, h_dim = 2, 8, 4, 128
    s = jax.random.normal(k_s, (B, s_dim), jnp.float32)
    a = jax.random.normal(k_a, (B, a_dim), jnp.float32)
    params = init_critic_params(k_p, s_dim, a_dim, h_dim)

    q1, q2 = critic_forward(s, a, params)
    q1, q2 = jax.block_until_ready((q1, q2))

    assert q1.shape == (B, 1) and q2.shape == (B, 1)

    r1, r2 = critic_ref_bf16(s, a, params)
    assert jnp.allclose(q1, r1, atol=5e-3, rtol=5e-3), (q1, r1)
    assert jnp.allclose(q2, r2, atol=5e-3, rtol=5e-3), (q2, r2)

    f1, f2 = critic_ref_f32(s, a, params)
    assert jnp.allclose(q1, f1, atol=1e-1, rtol=1e-1), (q1, f1)
    assert jnp.allclose(q2, f2, atol=1e-1, rtol=1e-1), (q2, f2)

    print("KERNEL_OK")
</pallas_src>

<mosaic_0001>
module attributes {stable_mosaic.version = 11 : i64} {
  func.func @critic_kernel(%arg0: i32, %arg1: memref<8x8xf32, #tpu.memory_space<vmem>>, %arg2: memref<8x4xf32, #tpu.memory_space<vmem>>, %arg3: memref<8x256xbf16, #tpu.memory_space<vmem>>, %arg4: memref<4x256xbf16, #tpu.memory_space<vmem>>, %arg5: memref<1x256xf32, #tpu.memory_space<vmem>>, %arg6: memref<2x128x128xbf16, #tpu.memory_space<vmem>>, %arg7: memref<2x1x128xf32, #tpu.memory_space<vmem>>, %arg8: memref<2x1x128xf32, #tpu.memory_space<vmem>>, %arg9: memref<2xf32, #tpu.memory_space<smem>>, %arg10: memref<8x2xf32, #tpu.memory_space<vmem>>) attributes {dimension_semantics = [#tpu.dimension_semantics<parallel>], iteration_bounds = array<i64: 1>, scalar_prefetch = 0 : i64, scratch_operands = 0 : i64, tpu.core_type = #tpu.core_type<tc>, window_params = [{transform_indices = @transform_0, window_bounds = array<i64: 8, 8>}, {transform_indices = @transform_1, window_bounds = array<i64: 8, 4>}, {pipeline_mode = #tpu.pipeline_mode<synchronous>, transform_indices = @transform_2, window_bounds = array<i64: 8, 256>}, {pipeline_mode = #tpu.pipeline_mode<synchronous>, transform_indices = @transform_3, window_bounds = array<i64: 4, 256>}, {pipeline_mode = #tpu.pipeline_mode<synchronous>, transform_indices = @transform_4, window_bounds = array<i64: 1, 256>}, {pipeline_mode = #tpu.pipeline_mode<synchronous>, transform_indices = @transform_5, window_bounds = array<i64: 2, 128, 128>}, {pipeline_mode = #tpu.pipeline_mode<synchronous>, transform_indices = @transform_6, window_bounds = array<i64: 2, 1, 128>}, {pipeline_mode = #tpu.pipeline_mode<synchronous>, transform_indices = @transform_7, window_bounds = array<i64: 2, 1, 128>}, {transform_indices = @transform_8, window_bounds = array<i64: 2>}, {transform_indices = @transform_9, window_bounds = array<i64: 8, 2>}]} {
    %c0 = arith.constant 0 : index
    %c0_0 = arith.constant 0 : index
    %0 = vector.load %arg1[%c0, %c0_0] : memref<8x8xf32, #tpu.memory_space<vmem>>, vector<8x8xf32>
    %1 = arith.truncf %0 : vector<8x8xf32> to vector<8x8xbf16>
    %c0_1 = arith.constant 0 : index
    %c0_2 = arith.constant 0 : index
    %2 = vector.load %arg2[%c0_1, %c0_2] : memref<8x4xf32, #tpu.memory_space<vmem>>, vector<8x4xf32>
    %3 = arith.truncf %2 : vector<8x4xf32> to vector<8x4xbf16>
    %c0_3 = arith.constant 0 : index
    %c0_4 = arith.constant 0 : index
    %4 = vector.load %arg3[%c0_3, %c0_4] : memref<8x256xbf16, #tpu.memory_space<vmem>>, vector<8x256xbf16>
    %cst = arith.constant dense<0.000000e+00> : vector<8x256xf32>
    %5 = tpu.matmul %1, %4, %cst {dimension_numbers = #tpu.dot_dimension_numbers<[1], [0], [0], [1], [0, 0, 1, 1], [], []>} : vector<8x8xbf16>, vector<8x256xbf16>, vector<8x256xf32> -> vector<8x256xf32>
    %c0_5 = arith.constant 0 : index
    %c0_6 = arith.constant 0 : index
    %6 = vector.load %arg4[%c0_5, %c0_6] : memref<4x256xbf16, #tpu.memory_space<vmem>>, vector<4x256xbf16>
    %cst_7 = arith.constant dense<0.000000e+00> : vector<8x256xf32>
    %7 = tpu.matmul %3, %6, %cst_7 {dimension_numbers = #tpu.dot_dimension_numbers<[1], [0], [0], [1], [0, 0, 1, 1], [], []>} : vector<8x4xbf16>, vector<4x256xbf16>, vector<8x256xf32> -> vector<8x256xf32>
    %8 = arith.addf %5, %7 : vector<8x256xf32>
    %c0_8 = arith.constant 0 : index
    %c0_9 = arith.constant 0 : index
    %9 = vector.load %arg5[%c0_8, %c0_9] : memref<1x256xf32, #tpu.memory_space<vmem>>, vector<1x256xf32>
    %10 = vector.broadcast %9 : vector<1x256xf32> to vector<8x256xf32>
    %11 = arith.addf %8, %10 : vector<8x256xf32>
    %cst_10 = arith.constant 0.000000e+00 : f32
    %12 = vector.broadcast %cst_10 : f32 to vector<8x256xf32>
    %13 = arith.maximumf %11, %12 : vector<8x256xf32>
    %14 = arith.truncf %13 : vector<8x256xf32> to vector<8x256xbf16>
    %15 = vector.extract_strided_slice %14 {offsets = [0, 0], sizes = [8, 128], strides = [1, 1]} : vector<8x256xbf16> to vector<8x128xbf16>
    %c0_11 = arith.constant 0 : index
    %c0_12 = arith.constant 0 : index
    %c0_13 = arith.constant 0 : index
    %16 = vector.load %arg6[%c0_11, %c0_12, %c0_13] : memref<2x128x128xbf16, #tpu.memory_space<vmem>>, vector<1x128x128xbf16>
    %17 = vector.shape_cast %16 : vector<1x128x128xbf16> to vector<128x128xbf16>
    %cst_14 = arith.constant dense<0.000000e+00> : vector<8x128xf32>
    %18 = tpu.matmul %15, %17, %cst_14 {dimension_numbers = #tpu.dot_dimension_numbers<[1], [0], [0], [1], [0, 0, 1, 1], [], []>} : vector<8x128xbf16>, vector<128x128xbf16>, vector<8x128xf32> -> vector<8x128xf32>
    %c0_15 = arith.constant 0 : index
    %c0_16 = arith.constant 0 : index
    %c0_17 = arith.constant 0 : index
    %19 = vector.load %arg7[%c0_15, %c0_16, %c0_17] : memref<2x1x128xf32, #tpu.memory_space<vmem>>, vector<1x1x128xf32>
    %20 = vector.shape_cast %19 : vector<1x1x128xf32> to vector<1x128xf32>
    %21 = vector.broadcast %20 : vector<1x128xf32> to vector<8x128xf32>
    %22 = arith.addf %18, %21 : vector<8x128xf32>
    %cst_18 = arith.constant 0.000000e+00 : f32
    %23 = vector.broadcast %cst_18 : f32 to vector<8x128xf32>
    %24 = arith.maximumf %22, %23 : vector<8x128xf32>
    %c0_19 = arith.constant 0 : index
    %c0_20 = arith.constant 0 : index
    %c0_21 = arith.constant 0 : index
    %25 = vector.load %arg8[%c0_19, %c0_20, %c0_21] : memref<2x1x128xf32, #tpu.memory_space<vmem>>, vector<1x1x128xf32>
    %26 = vector.shape_cast %25 : vector<1x1x128xf32> to vector<1x128xf32>
    %27 = vector.broadcast %26 : vector<1x128xf32> to vector<8x128xf32>
    %28 = arith.mulf %24, %27 : vector<8x128xf32>
    %cst_22 = arith.constant dense<0.000000e+00> : vector<8xf32>
    %29 = vector.multi_reduction <add>, %28, %cst_22 [1] : vector<8x128xf32> to vector<8xf32>
    %30 = vector.shape_cast %29 : vector<8xf32> to vector<8x1xf32>
    %c0_23 = arith.constant 0 : index
    %31 = memref.load %arg9[%c0_23] : memref<2xf32, #tpu.memory_space<smem>>
    %32 = vector.broadcast %31 : f32 to vector<8x1xf32>
    %33 = arith.addf %30, %32 : vector<8x1xf32>
    %c0_24 = arith.constant 0 : index
    %c0_25 = arith.constant 0 : index
    %34 = vector.load %arg10[%c0_24, %c0_25] : memref<8x2xf32, #tpu.memory_space<vmem>>, vector<8x1xf32>
    tpu.vector_store %arg10[%c0_24, %c0_25], %33 {strides = array<i32>} : memref<8x2xf32, #tpu.memory_space<vmem>>, vector<8x1xf32>,
    %35 = vector.extract_strided_slice %14 {offsets = [0, 128], sizes = [8, 128], strides = [1, 1]} : vector<8x256xbf16> to vector<8x128xbf16>
    %c1 = arith.constant 1 : index
    %c0_26 = arith.constant 0 : index
    %c0_27 = arith.constant 0 : index
    %36 = vector.load %arg6[%c1, %c0_26, %c0_27] : memref<2x128x128xbf16, #tpu.memory_space<vmem>>, vector<1x128x128xbf16>
    %37 = vector.shape_cast %36 : vector<1x128x128xbf16> to vector<128x128xbf16>
    %cst_28 = arith.constant dense<0.000000e+00> : vector<8x128xf32>
    %38 = tpu.matmul %35, %37, %cst_28 {dimension_numbers = #tpu.dot_dimension_numbers<[1], [0], [0], [1], [0, 0, 1, 1], [], []>} : vector<8x128xbf16>, vector<128x128xbf16>, vector<8x128xf32> -> vector<8x128xf32>
    %c1_29 = arith.constant 1 : index
    %c0_30 = arith.constant 0 : index
    %c0_31 = arith.constant 0 : index
    %39 = vector.load %arg7[%c1_29, %c0_30, %c0_31] : memref<2x1x128xf32, #tpu.memory_space<vmem>>, vector<1x1x128xf32>
    %40 = vector.shape_cast %39 : vector<1x1x128xf32> to vector<1x128xf32>
    %41 = vector.broadcast %40 : vector<1x128xf32> to vector<8x128xf32>
    %42 = arith.addf %38, %41 : vector<8x128xf32>
    %cst_32 = arith.constant 0.000000e+00 : f32
    %43 = vector.broadcast %cst_32 : f32 to vector<8x128xf32>
    %44 = arith.maximumf %42, %43 : vector<8x128xf32>
    %c1_33 = arith.constant 1 : index
    %c0_34 = arith.constant 0 : index
    %c0_35 = arith.constant 0 : index
    %45 = vector.load %arg8[%c1_33, %c0_34, %c0_35] : memref<2x1x128xf32, #tpu.memory_space<vmem>>, vector<1x1x128xf32>
    %46 = vector.shape_cast %45 : vector<1x1x128xf32> to vector<1x128xf32>
    %47 = vector.broadcast %46 : vector<1x128xf32> to vector<8x128xf32>
    %48 = arith.mulf %44, %47 : vector<8x128xf32>
    %cst_36 = arith.constant dense<0.000000e+00> : vector<8xf32>
    %49 = vector.multi_reduction <add>, %48, %cst_36 [1] : vector<8x128xf32> to vector<8xf32>
    %50 = vector.shape_cast %49 : vector<8xf32> to vector<8x1xf32>
    %c1_37 = arith.constant 1 : index
    %51 = memref.load %arg9[%c1_37] : memref<2xf32, #tpu.memory_space<smem>>
    %52 = vector.broadcast %51 : f32 to vector<8x1xf32>
    %53 = arith.addf %50, %52 : vector<8x1xf32>
    %c0_38 = arith.constant 0 : index
    %c1_39 = arith.constant 1 : index
    %54 = vector.load %arg10[%c0_38, %c1_39] : memref<8x2xf32, #tpu.memory_space<vmem>>, vector<8x1xf32>
    tpu.vector_store %arg10[%c0_38, %c1_39], %53 {strides = array<i32>} : memref<8x2xf32, #tpu.memory_space<vmem>>, vector<8x1xf32>,
    return
  }
  func.func @transform_0(%arg0: i32) -> (i32, i32) {
    %c0_i32 = arith.constant 0 : i32
    %c0_i32_0 = arith.constant 0 : i32
    return %arg0, %c0_i32 : i32, i32
  }
  func.func @transform_1(%arg0: i32) -> (i32, i32) {
    %c0_i32 = arith.constant 0 : i32
    %c0_i32_0 = arith.constant 0 : i32
    return %arg0, %c0_i32 : i32, i32
  }
  func.func @transform_2(%arg0: i32) -> (i32, i32) {
    %c0_i32 = arith.constant 0 : i32
    %c0_i32_0 = arith.constant 0 : i32
    %c0_i32_1 = arith.constant 0 : i32
    return %c0_i32, %c0_i32_0 : i32, i32
  }
  func.func @transform_3(%arg0: i32) -> (i32, i32) {
    %c0_i32 = arith.constant 0 : i32
    %c0_i32_0 = arith.constant 0 : i32
    %c0_i32_1 = arith.constant 0 : i32
    return %c0_i32, %c0_i32_0 : i32, i32
  }
  func.func @transform_4(%arg0: i32) -> (i32, i32) {
    %c0_i32 = arith.constant 0 : i32
    %c0_i32_0 = arith.constant 0 : i32
    %c0_i32_1 = arith.constant 0 : i32
    return %c0_i32, %c0_i32_0 : i32, i32
  }
  func.func @transform_5(%arg0: i32) -> (i32, i32, i32) {
    %c0_i32 = arith.constant 0 : i32
    %c0_i32_0 = arith.constant 0 : i32
    %c0_i32_1 = arith.constant 0 : i32
    %c0_i32_2 = arith.constant 0 : i32
    return %c0_i32, %c0_i32_0, %c0_i32_1 : i32, i32, i32
  }
  func.func @transform_6(%arg0: i32) -> (i32, i32, i32) {
    %c0_i32 = arith.constant 0 : i32
    %c0_i32_0 = arith.constant 0 : i32
    %c0_i32_1 = arith.constant 0 : i32
    %c0_i32_2 = arith.constant 0 : i32
    return %c0_i32, %c0_i32_0, %c0_i32_1 : i32, i32, i32
  }
  func.func @transform_7(%arg0: i32) -> (i32, i32, i32) {
    %c0_i32 = arith.constant 0 : i32
    %c0_i32_0 = arith.constant 0 : i32
    %c0_i32_1 = arith.constant 0 : i32
    %c0_i32_2 = arith.constant 0 : i32
    return %c0_i32, %c0_i32_0, %c0_i32_1 : i32, i32, i32
  }
  func.func @transform_8(%arg0: i32) -> i32 {
    %c0_i32 = arith.constant 0 : i32
    %c0_i32_0 = arith.constant 0 : i32
    return %c0_i32 : i32
  }
  func.func @transform_9(%arg0: i32) -> (i32, i32) {
    %c0_i32 = arith.constant 0 : i32
    %c0_i32_0 = arith.constant 0 : i32
    return %arg0, %c0_i32 : i32, i32
  }
}

</mosaic_0001>

<bundles_post_ra>
// kernel: critic_forward.1
= control target key start
LH: loop header
LB: loop body
LE: loop exit
PB: predicated region body
PF: predicated region fallthrough
CT: control target
= control target key end

     0   :  { %14 = vsyncpa [#allocation3], 0  ;;  %s728_s0 = inlined_call_operand.vmem [shape: f32[8,8], index: 0, kind: input, shape index: {}]   ;;  %s729_s1 = inlined_call_operand.vmem [shape: f32[8,4], index: 1, kind: input, shape index: {}]   ;;  %s730_s2 = inlined_call_operand.vmem [shape: bf16[8,256], index: 2, kind: input, shape index: {}]   ;;  %s731_s3 = inlined_call_operand.vmem [shape: bf16[4,256], index: 3, kind: input, shape index: {}]   ;;  %s732_s4 = inlined_call_operand.vmem [shape: f32[1,256], index: 4, kind: input, shape index: {}]   ;;  %s733_s5 = inlined_call_operand.vmem [shape: bf16[2,128,128], index: 5, kind: input, shape index: {}]   ;;  %s734_s6 = inlined_call_operand.vmem [shape: f32[2,1,128], index: 6, kind: input, shape index: {}]   ;;  %s735_s7 = inlined_call_operand.vmem [shape: f32[2,1,128], index: 7, kind: input, shape index: {}]   ;;  %s736_s8 = inlined_call_operand.vmem [shape: f32[2], index: 8, kind: input, shape index: {}]   ;;  %s737_s9 = inlined_call_operand.vmem [shape: f32[8,2], index: 9, kind: output, shape index: {}]  }
   0x1   :  { %s37_s11 = sshll.u32 %s736_s8, 4  ;;  %s38_s11 = int_to_ptr.vmem [resolvable:$true] %s37_s11 }
   0x2   :  { %s576_s12 = scalar_lea.vmem %s38_s11, 16  ;;  %p581_p1 = scmp.lt.s32.totalorder %s38_s11, %s38_s11 }
   0x3   :  { %p577_p0 = scmp.ne.s32.totalorder %s38_s11, %s576_s12  ;;  %p582_p2 = scmp.lt.s32.totalorder %s576_s12, %s576_s12 }
   0x5   :  { %p583_p3 = por %p582_p2, %p581_p1 }
   0x7   :  { %p584_p4 = pnand %p583_p3, %p577_p0 }
   0x9   :  { %587 = shalt.err (!%p584_p4)
}
   0xa   :  { %s590_s13 = smov [#allocation2]  }
   0xb   :  { %40 = dma.vmem_to_smem %s38_s11, 16, %s590_s13, [#allocation3]  }
   0xc   :  { %588 = dma.done.wait [#allocation3], 16  }
   0xd   :  { %589 = vsyncadd [#allocation3], 4294967280 }
   0xe   :  { %44 = sfence }
   0xf   :  { %v450_v0 = vld.sshfl [vmem:[%s731_s3] sm:$0x33 pattern:$0x76325410]  ;;  %vm65_vm0 = vcmask 1041408   ;;  %vm122_vm1 = vcmask 1043456   ;;  %v172_v29 = vlaneseq }
  0x10   :  { %v50_v1 = vld [vmem:[%s730_s2] sm:$0xff]  ;;  %v60_v2 = vcombine.high %v450_v0, %v450_v0  ;;  %v67_v4 = vsel %vm65_vm0, %v450_v0, 0  ;;  %vm61_vm2 = vcmask 31744   ;;  %v591_v10 = vmov 0   ;;  %v562_v15 = vld [vmem:[%s733_s5 + $0x8] sm:$0xff]   ;;  %v564_v17 = vld [vmem:[%s733_s5 + $0x10] sm:$0xff]  }
  0x11   :  { %v454_v3 = vcombine.high %v50_v1, %v50_v1  ;;  %v48_v5 = vld [vmem:[%s729_s1] sm:$0xff]  ;;  %v453_v7 = vcombine.low %v50_v1, %v50_v1  ;;  %104 = vmatprep.mubr.bf16.mxu0 %v591_v10  ;;  %161 = vmatprep.mubr.bf16.mxu1 %v591_v10  ;;  %vm118_vm3 = vcmask 64512   ;;  %v592_v14 = vmov 0.0   ;;  %v563_v16 = vld [vmem:[%s733_s5 + $0x48] sm:$0xff]   ;;  %v565_v18 = vld [vmem:[%s733_s5 + $0x50] sm:$0xff]   ;;  %s495_s10 = sld [smem:[#allocation2 + $0x1]] }
  0x12   :  { %v46_v6 = vld [vmem:[%s728_s0] sm:$0xff]  ;;  %451 = vmatprep.subr.msk.bf16.mxu0 %vm65_vm0, %v60_v2  ;;  %v49_v8 = vpack.c.bf16 %v48_v5, %v48_v5  ;;  %v566_v19 = vld [vmem:[%s733_s5 + $0x18] sm:$0xff]   ;;  %v570_v23 = vld [vmem:[%s733_s5 + $0x28] sm:$0xff]   ;;  %vm593_vm4 = vmmov 0   ;;  %v173_v30 = vshrl.u32 %v172_v29, 7  ;;  %vm313_vm5 = vcmask 7168  }
  0x13   :  { %455 = vmatprep.subr.msk.bf16.mxu1 %vm122_vm1, %v454_v3  ;;  %73 = vmatpush1.bf16.msra.mxu0 %v67_v4  ;;  %v124_v9 = vsel %vm122_vm1, %v453_v7, 0  ;;  %v47_v11 = vpack.c.bf16 %v46_v6, %v46_v6  ;;  %v560_v12 = vld [vmem:[%s733_s5] sm:$0xff]   ;;  %v567_v20 = vld [vmem:[%s733_s5 + $0x58] sm:$0xff]   ;;  %v571_v24 = vld [vmem:[%s733_s5 + $0x68] sm:$0xff]   ;;  %vm443_vm6 = vcmask 15368  }
  0x14   :  { %130 = vmatpush1.bf16.msra.mxu1 %v124_v9  ;;  %v561_v13 = vld [vmem:[%s733_s5 + $0x40] sm:$0xff]   ;;  %514 = vmatprep.subr.bf16.mxu0 %v592_v14  ;;  %v572_v25 = vld [vmem:[%s733_s5 + $0x30] sm:$0xff]   ;;  %v574_v27 = vld [vmem:[%s733_s5 + $0x38] sm:$0xff]   ;;  %v174_v31 = vsub.s32 0, %v173_v30  ;;  %v178_v33 = vsub.s32 1, %v173_v30 }
  0x15   :  { %534 = vmatprep.subr.bf16.mxu1 %v592_v14  ;;  %v568_v21 = vld [vmem:[%s733_s5 + $0x20] sm:$0xff]   ;;  %v573_v26 = vld [vmem:[%s733_s5 + $0x70] sm:$0xff]   ;;  %v575_v28 = vld [vmem:[%s733_s5 + $0x78] sm:$0xff]  }
  0x16   :  { %452 = vmatmul.mubr.msk.bf16.vlgmr.msra.gmra.mrb[0].mxu0 %vm61_vm2, %v49_v8  ;;  %v569_v22 = vld [vmem:[%s733_s5 + $0x60] sm:$0xff]  }
  0x17   :  { %456 = vmatmul.mubr.msk.bf16.vlgmr.msra.gmra.mrb[0].mxu1 %vm118_vm3, %v47_v11  ;;  %515 = vmatpush3.bf16.msra.mxu0 %v560_v12  ;;  %v170_v32 = vld [vmem:[%s732_s4] sm:$0x3]  ;;  %v441_v9 = vstv %s495_s10 }
  0x18   :  { %535 = vmatpush3.bf16.msra.mxu1 %v561_v13  ;;  %516 = vmatprep.subr.bf16.mxu0 %v592_v14  ;;  %v175_v35 = vrot.slane %v170_v32, %v174_v31  ;;  %v179_v38 = vrot.slane %v170_v32, %v178_v33  ;;  %v457_v52 = vld [vmem:[%s734_s6] ss:$0 sm:$0xff]  ;;  %v484_v53 = vld [vmem:[%s734_s6 + $0x1] ss:$0 sm:$0xff]  ;;  %s310_s6 = sld [smem:[#allocation2]] }
  0x19   :  { %536 = vmatprep.subr.bf16.mxu1 %v592_v14  ;;  %530 = vmatprep.mubr.msk.bf16.mxu0 %vm593_vm4, %v592_v14  ;;  %v466_v61 = vld [vmem:[%s735_s7] ss:$0 sm:$0xff]  ;;  %v494_v4 = vld [vmem:[%s735_s7 + $0x1] ss:$0 sm:$0xff] }
  0x1a   :  { %550 = vmatprep.mubr.msk.bf16.mxu1 %vm593_vm4, %v592_v14 }
  0x1b   :  { %517 = vmatpush3.bf16.msra.mxu0 %v562_v15 }
  0x1c   :  { %537 = vmatpush3.bf16.msra.mxu1 %v563_v16  ;;  %518 = vmatprep.subr.bf16.mxu0 %v592_v14 }
  0x1d   :  { %538 = vmatprep.subr.bf16.mxu1 %v592_v14 }
  0x1e   :  { %v311_v6 = vstv %s310_s6 }
  0x1f   :  { %519 = vmatpush3.bf16.msra.mxu0 %v564_v17 }
  0x20   :  { %539 = vmatpush3.bf16.msra.mxu1 %v565_v18  ;;  %520 = vmatprep.subr.bf16.mxu0 %v592_v14 }
  0x21   :  { %540 = vmatprep.subr.bf16.mxu1 %v592_v14 }
  0x23   :  { %521 = vmatpush3.bf16.msra.mxu0 %v566_v19 }
  0x24   :  { %541 = vmatpush3.bf16.msra.mxu1 %v567_v20  ;;  %522 = vmatprep.subr.bf16.mxu0 %v592_v14 }
  0x25   :  { %542 = vmatprep.subr.bf16.mxu1 %v592_v14 }
  0x27   :  { %523 = vmatpush3.bf16.msra.mxu0 %v568_v21 }
  0x28   :  { %543 = vmatpush3.bf16.msra.mxu1 %v569_v22  ;;  %524 = vmatprep.subr.bf16.mxu0 %v592_v14 }
  0x29   :  { %544 = vmatprep.subr.bf16.mxu1 %v592_v14 }
  0x2b   :  { %525 = vmatpush3.bf16.msra.mxu0 %v570_v23 }
  0x2c   :  { %545 = vmatpush3.bf16.msra.mxu1 %v571_v24  ;;  %526 = vmatprep.subr.bf16.mxu0 %v592_v14 }
  0x2d   :  { %546 = vmatprep.subr.bf16.mxu1 %v592_v14 }
  0x2f   :  { %527 = vmatpush3.bf16.msra.mxu0 %v572_v25 }
  0x30   :  { %547 = vmatpush3.bf16.msra.mxu1 %v573_v26  ;;  %528 = vmatprep.subr.bf16.mxu0 %v592_v14 }
  0x31   :  { %548 = vmatprep.subr.bf16.mxu1 %v592_v14 }
  0x33   :  { %529 = vmatpush3.bf16.msra.mxu0 %v574_v27 }
  0x34   :  { %549 = vmatpush3.bf16.msra.mxu1 %v575_v28 }
  0xe9   :  { %v106_v34 = vpop.f32.mrb[0].mxu0 }
  0xea   :  { %v163_v36 = vpop.f32.mrb[0].mxu1  ;;  %v108_v37 = vpop.f32.mrb[1].mxu0 }
  0xeb   :  { %v164_v39 = vadd.f32 %v163_v36, %v106_v34  ;;  %v165_v40 = vpop.f32.mrb[1].mxu1  ;;  %v110_v41 = vpop.f32.mrb[2].mxu0 }
  0xec   :  { %v166_v42 = vadd.f32 %v165_v40, %v108_v37  ;;  %v167_v43 = vpop.f32.mrb[2].mxu1  ;;  %v111_v44 = vpop.f32.mrb[3].mxu0 }
  0xed   :  { %v182_v45 = vadd.f32 %v175_v35, %v164_v39  ;;  %v168_v46 = vpop.f32.mrb[3].mxu1 }
  0xee   :  { %v183_v47 = vadd.f32 %v179_v38, %v166_v42 }
  0xef   :  { %v184_v48 = vmax.f32 %v182_v45, 0.0 }
  0xf0   :  { %v185_v49 = vmax.f32 %v183_v47, 0.0 }
  0xf1   :  { %v186_v50 = vpack.c.bf16 %v184_v48, %v184_v48 }
  0xf2   :  { %v187_v51 = vpack.c.bf16 %v185_v49, %v185_v49 }
  0xf3   :  { %531 = vmatmul.mubr.bf16.vlgmr.msra.gmra.mrb[4].mxu0 %v186_v50 }
  0xf4   :  { %551 = vmatmul.mubr.bf16.vlgmr.msra.gmra.mrb[4].mxu1 %v187_v51 }
 0x1c6   :  { %v293_v54 = vpop.f32.mrb[4].mxu0 }
 0x1c7   :  { %v294_v55 = vadd.f32 %v457_v52, %v293_v54  ;;  %v532_v56 = vpop.f32.mrb[5].mxu0  ;;  %v422_v57 = vpop.f32.mrb[4].mxu1 }
 0x1c8   :  { %v423_v58 = vadd.f32 %v484_v53, %v422_v57  ;;  %v296_v59 = vpop.f32.mrb[6].mxu0  ;;  %v552_v60 = vpop.f32.mrb[5].mxu1 }
 0x1c9   :  { %v299_v62 = vmax.f32 %v294_v55, 0.0  ;;  %v533_v63 = vpop.f32.mrb[7].mxu0  ;;  %v425_v0 = vpop.f32.mrb[6].mxu1 }
 0x1ca   :  { %v553_v1 = vpop.f32.mrb[7].mxu1  ;;  %v428_v2 = vmax.f32 %v423_v58, 0.0 }
 0x1cb   :  { %v307_v3 = vmul.f32 %v466_v61, %v299_v62 }
 0x1cc   :  { %v437_v5 = vmul.f32 %v494_v4, %v428_v2 }
 0x1cd   :  { %308 = vadd.xlane.f32.xlu0 %v307_v3 }
 0x1d1   :  { %438 = vadd.xlane.f32.xlu0 %v437_v5 }
 0x25a   :  { %v309_v7 = vpop.xlane.xlu0 %308 }
 0x25b   :  { %v312_v8 = vadd.f32 %v311_v6, %v309_v7 }
 0x25d   :  { %314 = vst.msk [vmem:[%s737_s9] sm:$0xff] %vm313_vm5, %v312_v8 }
 0x25e   :  { %v439_v10 = vpop.xlane.xlu0 %438 }
 0x25f   :  { %v442_v11 = vadd.f32 %v441_v9, %v439_v10 }
 0x261   :  { %444 = vst.msk [vmem:[%s737_s9] sm:$0xff] %vm443_vm6, %v442_v11 }
 0x262   :  { %449 = vsyncpa [#allocation3], 1 }

</bundles_post_ra>
